<compile_context>
chip_gen: v7x
topology: tpu7x:2x2x1
jax: 0.10.0
libtpu: 0.0.40
codegen_flags: <defaults>
</compile_context>

<pallas_src>
import functools

import jax
import jax.numpy as jnp
from jax.experimental import pallas as pl
from jax.experimental.pallas import tpu as pltpu


def _se_kernel(x_ref, w1_ref, b1_ref, w2_ref, b2_ref, o_ref,
               avg_cn_ref, gate_col_ref, *, nb, c, inv_hw):
    """One grid step processes `nb` batch elements as one (nb*c, HW) tile."""
    x = x_ref[...]                                            # (nb*c, HW), x dtype

    # Squeeze: spatial mean per (n, c) row, accumulated in f32.
    avg = jnp.sum(x.astype(jnp.float32), axis=-1, keepdims=True) * inv_hw  # (nb*c, 1)

    # Gather per-batch means into a lane-dense (c, nb) scratch tile.
    # (tiny static writes; nb is bounded by _pick_batch_per_step)
    for n in range(nb):
        avg_cn_ref[:, n:n + 1] = avg[n * c:(n + 1) * c, :]

    # Excite: both 1x1 convs as batched matmuls (nb-lane-wide MXU output).
    # For real SE layers C=256..2048 so the MXU form is the right one; at the
    # toy sizes in the demo the matmul cost is negligible either way.
    w1 = w1_ref[...].astype(jnp.float32)
    w2 = w2_ref[...].astype(jnp.float32)
    b1 = b1_ref[...].astype(jnp.float32)
    b2 = b2_ref[...].astype(jnp.float32)
    h = jnp.dot(w1, avg_cn_ref[...], preferred_element_type=jnp.float32)
    h = jnp.maximum(h + b1, 0.0)                              # (cr, nb)
    s = jnp.dot(w2, h, preferred_element_type=jnp.float32)
    s = jax.nn.sigmoid(s + b2)                                # (c, nb)

    # Scatter the gate into an (nb*c, 1) column scratch (tiny static writes),
    # then ONE unmasked full-tile multiply + store.
    for n in range(nb):
        gate_col_ref[n * c:(n + 1) * c, :] = s[:, n:n + 1]
    o_ref[...] = x * gate_col_ref[...].astype(x.dtype)


def _tpu_budgets():
    """Generation-dependent block budget / vmem-limit cap / min grid steps."""
    phys = 128 * 1024 * 1024
    try:
        info = pltpu.get_tpu_info()
        phys = int(getattr(info, "vmem_capacity_bytes", phys))
    except Exception:
        pass
    if phys <= 64 * 1024 * 1024:
        # v7x-class: 64 MiB physical per TensorCore, 2 TCs -> prefer >=2 steps.
        return dict(block_budget=4 * 1024 * 1024,
                    limit_cap=44 * 1024 * 1024,
                    min_steps=2)
    # v5e / v6e: 128 MiB physical, single TensorCore -> grow blocks.
    return dict(block_budget=7 * 1024 * 1024,
                limit_cap=96 * 1024 * 1024,
                min_steps=1)


def _pick_batch_per_step(n, c, hw, itemsize, block_budget, min_steps):
    """Batch elements per grid step.

    Constraints: nb divides n (uniform blocks); nb*c is a multiple of the
    sublane packing (8 for f32, 16 for bf16) unless nb == n (full-extent dims
    are exempt); nb <= 64 to bound the unrolled gather/scatter loops.
    Preference order: fits budget with >= min_steps grid steps > fits budget >
    smallest legal block (wrapper raises vmem_limit_bytes for that case).
    """
    sub = 16 if itemsize == 2 else 8
    row_bytes = c * hw * itemsize
    candidates = []
    for nb in range(min(n, 64), 0, -1):
        if n % nb:
            continue
        if (nb * c) % sub != 0 and nb != n:
            continue
        candidates.append(nb)
    if not candidates:
        return n  # degenerate tiny-C / huge-N config; accept the full batch
    fits = [nb for nb in candidates if nb * row_bytes <= block_budget]
    pref = [nb for nb in fits if n // nb >= min_steps]
    if pref:
        return max(pref)
    if fits:
        return max(fits)
    return min(candidates)


def se_module(x, w1, b1, w2, b2):
    """SEModule forward. x: (N,C,H,W); w1: (Cr,C); b1: (Cr,); w2: (C,Cr); b2: (C,)."""
    N, C, H, W = x.shape
    Cr = w1.shape[0]
    HW = H * W

    # Row-major reshape is a bitcast: no extra HBM traffic, no pad, no slice.
    x2 = x.reshape(N * C, HW)
    itemsize = x2.dtype.itemsize

    cfg = _tpu_budgets()
    nb = _pick_batch_per_step(N, C, HW, itemsize,
                              cfg["block_budget"], cfg["min_steps"])
    grid = (N // nb,)

    # vmem limit: in + out double-buffered blocks + weights + padded scratch.
    block_bytes = nb * C * HW * itemsize
    w_bytes = (2 * C * Cr + C + Cr) * 4
    scratch_bytes = 4 * 128 * (C + nb * C) + (64 << 10)
    needed = 4 * block_bytes + w_bytes + scratch_bytes + (2 << 20)
    vmem_limit = int(min(cfg["limit_cap"], max(32 << 20, needed)))

    b1_col = b1.reshape(Cr, 1)                     # column biases: no .T in kernel
    b2_col = b2.reshape(C, 1)

    kernel = functools.partial(_se_kernel, nb=nb, c=C, inv_hw=1.0 / float(HW))

    cost = pl.CostEstimate(
        flops=2 * N * C * HW + 4 * N * C * Cr,
        transcendentals=N * C,
        bytes_accessed=2 * N * C * HW * itemsize + w_bytes,
    )

    out2 = pl.pallas_call(
        kernel,
        out_shape=jax.ShapeDtypeStruct((N * C, HW), x2.dtype),
        grid_spec=pltpu.PrefetchScalarGridSpec(
            num_scalar_prefetch=0,
            grid=grid,
            in_specs=[
                pl.BlockSpec((nb * C, HW), lambda i: (i, 0)),
                pl.BlockSpec((Cr, C), lambda i: (0, 0)),
                pl.BlockSpec((Cr, 1), lambda i: (0, 0)),
                pl.BlockSpec((C, Cr), lambda i: (0, 0)),
                pl.BlockSpec((C, 1), lambda i: (0, 0)),
            ],
            out_specs=pl.BlockSpec((nb * C, HW), lambda i: (i, 0)),
            scratch_shapes=[
                pltpu.VMEM((C, nb), jnp.float32),        # gathered means (C, nb)
                pltpu.VMEM((nb * C, 1), jnp.float32),    # gate column
            ],
        ),
        compiler_params=pltpu.CompilerParams(
            dimension_semantics=("parallel",),
            vmem_limit_bytes=vmem_limit,
        ),
        # Pure in-place scale of x: when x is a dead intermediate (its only
        # consumer is the SE gate, as in SEResNeXtBottleneck), the output
        # reuses x's HBM buffer; XLA inserts a copy only if x stays live.
        input_output_aliases={0: 0},
        cost_estimate=cost,
    )(x2, w1, b1_col, w2, b2_col)

    return out2.reshape(N, C, H, W)


def se_module_ref(x, w1, b1, w2, b2):
    """Pure-JAX reference mirroring the PyTorch SEModule.forward."""
    avg = jnp.mean(x, axis=(2, 3), keepdims=True)              # (N, C, 1, 1)
    h = jnp.einsum("nchw,oc->nohw", avg, w1) + b1[None, :, None, None]
    h = jnp.maximum(h, 0.0)
    s = jnp.einsum("nchw,oc->nohw", h, w2) + b2[None, :, None, None]
    s = jax.nn.sigmoid(s)
    return x * s


if __name__ == "__main__":
    # SEModule(channels=4, reduction=2); input (2, 4, 16, 16)
    N, C, H, W = 2, 4, 16, 16
    reduction = 2
    Cr = C // reduction

    key = jax.random.PRNGKey(0)
    kx, k1, k2, k3, k4 = jax.random.split(key, 5)

    x = jax.random.normal(kx, (N, C, H, W), dtype=jnp.float32)
    w1 = jax.random.normal(k1, (Cr, C), dtype=jnp.float32) * 0.1   # fc1.weight[:, :, 0, 0]
    b1 = jax.random.normal(k2, (Cr,), dtype=jnp.float32) * 0.1     # fc1.bias
    w2 = jax.random.normal(k3, (C, Cr), dtype=jnp.float32) * 0.1   # fc2.weight[:, :, 0, 0]
    b2 = jax.random.normal(k4, (C,), dtype=jnp.float32) * 0.1      # fc2.bias

    ref = jax.block_until_ready(se_module_ref(x, w1, b1, w2, b2))

    out = jax.jit(se_module)(x, w1, b1, w2, b2)
    out = jax.block_until_ready(out)

    assert out.shape == (N, C, H, W)
    assert jnp.allclose(out, ref, atol=1e-5, rtol=1e-5)

    print("KERNEL_OK")
</pallas_src>

<mosaic_0001>
module attributes {stable_mosaic.version = 11 : i64} {
  func.func @_se_kernel(%arg0: i32, %arg1: memref<8x256xf32, #tpu.memory_space<vmem>>, %arg2: memref<2x4xf32, #tpu.memory_space<vmem>>, %arg3: memref<2x1xf32, #tpu.memory_space<vmem>>, %arg4: memref<4x2xf32, #tpu.memory_space<vmem>>, %arg5: memref<4x1xf32, #tpu.memory_space<vmem>>, %arg6: memref<8x256xf32, #tpu.memory_space<vmem>>, %arg7: memref<4x2xf32, #tpu.memory_space<vmem>>, %arg8: memref<8x1xf32, #tpu.memory_space<vmem>>) attributes {dimension_semantics = [#tpu.dimension_semantics<parallel>], iteration_bounds = array<i64: 1>, scalar_prefetch = 0 : i64, scratch_operands = 2 : i64, tpu.core_type = #tpu.core_type<tc>, window_params = [{transform_indices = @transform_0, window_bounds = array<i64: 8, 256>}, {pipeline_mode = #tpu.pipeline_mode<synchronous>, transform_indices = @transform_1, window_bounds = array<i64: 2, 4>}, {pipeline_mode = #tpu.pipeline_mode<synchronous>, transform_indices = @transform_2, window_bounds = array<i64: 2, 1>}, {pipeline_mode = #tpu.pipeline_mode<synchronous>, transform_indices = @transform_3, window_bounds = array<i64: 4, 2>}, {pipeline_mode = #tpu.pipeline_mode<synchronous>, transform_indices = @transform_4, window_bounds = array<i64: 4, 1>}, {transform_indices = @transform_5, window_bounds = array<i64: 8, 256>}]} {
    %c0 = arith.constant 0 : index
    %c0_0 = arith.constant 0 : index
    %0 = vector.load %arg1[%c0, %c0_0] : memref<8x256xf32, #tpu.memory_space<vmem>>, vector<8x256xf32>
    %cst = arith.constant dense<0.000000e+00> : vector<8xf32>
    %1 = vector.multi_reduction <add>, %0, %cst [1] : vector<8x256xf32> to vector<8xf32>
    %2 = vector.shape_cast %1 : vector<8xf32> to vector<8x1xf32>
    %cst_1 = arith.constant 3.906250e-03 : f32
    %3 = vector.broadcast %cst_1 : f32 to vector<8x1xf32>
    %4 = arith.mulf %2, %3 : vector<8x1xf32>
    %5 = vector.extract_strided_slice %4 {offsets = [0, 0], sizes = [4, 1], strides = [1, 1]} : vector<8x1xf32> to vector<4x1xf32>
    %c0_2 = arith.constant 0 : index
    %c0_3 = arith.constant 0 : index
    %6 = vector.load %arg7[%c0_2, %c0_3] : memref<4x2xf32, #tpu.memory_space<vmem>>, vector<4x1xf32>
    tpu.vector_store %arg7[%c0_2, %c0_3], %5 {strides = array<i32>} : memref<4x2xf32, #tpu.memory_space<vmem>>, vector<4x1xf32>,
    %7 = vector.extract_strided_slice %4 {offsets = [4, 0], sizes = [4, 1], strides = [1, 1]} : vector<8x1xf32> to vector<4x1xf32>
    %c0_4 = arith.constant 0 : index
    %c1 = arith.constant 1 : index
    %8 = vector.load %arg7[%c0_4, %c1] : memref<4x2xf32, #tpu.memory_space<vmem>>, vector<4x1xf32>
    tpu.vector_store %arg7[%c0_4, %c1], %7 {strides = array<i32>} : memref<4x2xf32, #tpu.memory_space<vmem>>, vector<4x1xf32>,
    %c0_5 = arith.constant 0 : index
    %c0_6 = arith.constant 0 : index
    %9 = vector.load %arg2[%c0_5, %c0_6] : memref<2x4xf32, #tpu.memory_space<vmem>>, vector<2x4xf32>
    %c0_7 = arith.constant 0 : index
    %c0_8 = arith.constant 0 : index
    %10 = vector.load %arg4[%c0_7, %c0_8] : memref<4x2xf32, #tpu.memory_space<vmem>>, vector<4x2xf32>
    %c0_9 = arith.constant 0 : index
    %c0_10 = arith.constant 0 : index
    %11 = vector.load %arg3[%c0_9, %c0_10] : memref<2x1xf32, #tpu.memory_space<vmem>>, vector<2x1xf32>
    %c0_11 = arith.constant 0 : index
    %c0_12 = arith.constant 0 : index
    %12 = vector.load %arg5[%c0_11, %c0_12] : memref<4x1xf32, #tpu.memory_space<vmem>>, vector<4x1xf32>
    %c0_13 = arith.constant 0 : index
    %c0_14 = arith.constant 0 : index
    %13 = vector.load %arg7[%c0_13, %c0_14] : memref<4x2xf32, #tpu.memory_space<vmem>>, vector<4x2xf32>
    %cst_15 = arith.constant dense<0.000000e+00> : vector<2x2xf32>
    %14 = tpu.matmul %9, %13, %cst_15 {dimension_numbers = #tpu.dot_dimension_numbers<[1], [0], [0], [1], [0, 0, 1, 1], [], []>} : vector<2x4xf32>, vector<4x2xf32>, vector<2x2xf32> -> vector<2x2xf32>
    %15 = vector.broadcast %11 : vector<2x1xf32> to vector<2x2xf32>
    %16 = arith.addf %14, %15 : vector<2x2xf32>
    %cst_16 = arith.constant 0.000000e+00 : f32
    %17 = vector.broadcast %cst_16 : f32 to vector<2x2xf32>
    %18 = arith.maximumf %16, %17 : vector<2x2xf32>
    %cst_17 = arith.constant dense<0.000000e+00> : vector<4x2xf32>
    %19 = tpu.matmul %10, %18, %cst_17 {dimension_numbers = #tpu.dot_dimension_numbers<[1], [0], [0], [1], [0, 0, 1, 1], [], []>} : vector<4x2xf32>, vector<2x2xf32>, vector<4x2xf32> -> vector<4x2xf32>
    %20 = vector.broadcast %12 : vector<4x1xf32> to vector<4x2xf32>
    %21 = arith.addf %19, %20 : vector<4x2xf32>
    %22 = arith.negf %21 : vector<4x2xf32>
    %23 = math.exp %22 : vector<4x2xf32>
    %cst_18 = arith.constant 1.000000e+00 : f32
    %24 = vector.broadcast %cst_18 : f32 to vector<4x2xf32>
    %25 = arith.addf %24, %23 : vector<4x2xf32>
    %26 = arith.divf %24, %25 : vector<4x2xf32>
    %27 = vector.extract_strided_slice %26 {offsets = [0, 0], sizes = [4, 1], strides = [1, 1]} : vector<4x2xf32> to vector<4x1xf32>
    %c0_19 = arith.constant 0 : index
    %c0_20 = arith.constant 0 : index
    %28 = vector.load %arg8[%c0_19, %c0_20] : memref<8x1xf32, #tpu.memory_space<vmem>>, vector<4x1xf32>
    tpu.vector_store %arg8[%c0_19, %c0_20], %27 {strides = array<i32>} : memref<8x1xf32, #tpu.memory_space<vmem>>, vector<4x1xf32>,
    %29 = vector.extract_strided_slice %26 {offsets = [0, 1], sizes = [4, 1], strides = [1, 1]} : vector<4x2xf32> to vector<4x1xf32>
    %c4 = arith.constant 4 : index
    %c0_21 = arith.constant 0 : index
    %30 = vector.load %arg8[%c4, %c0_21] : memref<8x1xf32, #tpu.memory_space<vmem>>, vector<4x1xf32>
    tpu.vector_store %arg8[%c4, %c0_21], %29 {strides = array<i32>} : memref<8x1xf32, #tpu.memory_space<vmem>>, vector<4x1xf32>,
    %c0_22 = arith.constant 0 : index
    %c0_23 = arith.constant 0 : index
    %31 = vector.load %arg8[%c0_22, %c0_23] : memref<8x1xf32, #tpu.memory_space<vmem>>, vector<8x1xf32>
    %32 = vector.broadcast %31 : vector<8x1xf32> to vector<8x256xf32>
    %33 = arith.mulf %0, %32 : vector<8x256xf32>
    %c0_24 = arith.constant 0 : index
    %c0_25 = arith.constant 0 : index
    %34 = vector.load %arg6[%c0_24, %c0_25] : memref<8x256xf32, #tpu.memory_space<vmem>>, vector<8x256xf32>
    tpu.vector_store %arg6[%c0_24, %c0_25], %33 {strides = array<i32>} : memref<8x256xf32, #tpu.memory_space<vmem>>, vector<8x256xf32>,
    return
  }
  func.func @transform_0(%arg0: i32) -> (i32, i32) {
    %c0_i32 = arith.constant 0 : i32
    %c0_i32_0 = arith.constant 0 : i32
    return %arg0, %c0_i32 : i32, i32
  }
  func.func @transform_1(%arg0: i32) -> (i32, i32) {
    %c0_i32 = arith.constant 0 : i32
    %c0_i32_0 = arith.constant 0 : i32
    %c0_i32_1 = arith.constant 0 : i32
    return %c0_i32, %c0_i32_0 : i32, i32
  }
  func.func @transform_2(%arg0: i32) -> (i32, i32) {
    %c0_i32 = arith.constant 0 : i32
    %c0_i32_0 = arith.constant 0 : i32
    %c0_i32_1 = arith.constant 0 : i32
    return %c0_i32, %c0_i32_0 : i32, i32
  }
  func.func @transform_3(%arg0: i32) -> (i32, i32) {
    %c0_i32 = arith.constant 0 : i32
    %c0_i32_0 = arith.constant 0 : i32
    %c0_i32_1 = arith.constant 0 : i32
    return %c0_i32, %c0_i32_0 : i32, i32
  }
  func.func @transform_4(%arg0: i32) -> (i32, i32) {
    %c0_i32 = arith.constant 0 : i32
    %c0_i32_0 = arith.constant 0 : i32
    %c0_i32_1 = arith.constant 0 : i32
    return %c0_i32, %c0_i32_0 : i32, i32
  }
  func.func @transform_5(%arg0: i32) -> (i32, i32) {
    %c0_i32 = arith.constant 0 : i32
    %c0_i32_0 = arith.constant 0 : i32
    return %arg0, %c0_i32 : i32, i32
  }
}

</mosaic_0001>

<bundles_post_ra>
// kernel: se_module.1
= control target key start
LH: loop header
LB: loop body
LE: loop exit
PB: predicated region body
PF: predicated region fallthrough
CT: control target
= control target key end

     0   :  { %v257_v3 = vmov 0.0   ;;  %vm258_vm0 = vmmov 0   ;;  %v259_v4 = vmov 0   ;;  %vm26_vm1 = vcmask 3072   ;;  %s318_s0 = inlined_call_operand.vmem [shape: f32[8,256], index: 0, kind: input, shape index: {}, may-alias: {0,5}]   ;;  %s319_s2 = inlined_call_operand.vmem [shape: f32[2,1], index: 2, kind: input, shape index: {}]   ;;  %s320_s1 = inlined_call_operand.vmem [shape: f32[2,4], index: 1, kind: input, shape index: {}]   ;;  %s321_s4 = inlined_call_operand.vmem [shape: f32[4,1], index: 4, kind: input, shape index: {}]   ;;  %s322_s3 = inlined_call_operand.vmem [shape: f32[4,2], index: 3, kind: input, shape index: {}]   ;;  %s323_s5 = inlined_call_operand.vmem [shape: f32[8,256], index: 5, kind: output, shape index: {}, may-alias: {0,5}]  }
   0x1   :  { %v20_v0 = vld [vmem:[%s318_s0] sm:$0xff]  ;;  %v21_v1 = vld [vmem:[%s318_s0 + $0x8] sm:$0xff]  ;;  %237 = vmatprep.subr.mxu0 %v257_v3  ;;  %242 = vmatprep.subr.mxu1 %v257_v3  ;;  %vm28_vm2 = vcmask 15372   ;;  %vm44_vm3 = vcmask 1043456   ;;  %vm40_vm4 = vcmask 31744   ;;  %vm128_vm5 = vcmask 1041408  }
   0x2   :  { %v22_v2 = vadd.f32 %v21_v1, %v20_v0  ;;  %239 = vmatprep.mubr.msk.f32.mxu0 %vm258_vm0, %v257_v3  ;;  %244 = vmatprep.mubr.msk.f32.mxu1 %vm258_vm0, %v257_v3  ;;  %v32_v5 = vld [vmem:[%s319_s2] sm:$0x3]  ;;  %vm124_vm6 = vcmask 15360  }
   0x3   :  { %251 = vset.pattern.permute.xlu0 %v259_v4  ;;  %252 = vset.pattern.permute.xlu1 %v259_v4  ;;  %v30_v8 = vld [vmem:[%s320_s1] sm:$0x3]  ;;  %s260_s1 = smov 127  }
   0x4   :  { %23 = vadd.xlane.f32.xlu0 %v22_v2  ;;  %v33_v10 = vld [vmem:[%s321_s4] sm:$0xf] }
   0x5   :  { %121 = vperm.xlu1 %252, %v33_v10   ;;  %v31_v16 = vld [vmem:[%s322_s3] sm:$0xf] }
  0x1a   :  { %37 = vperm.xlu0 %251, %v32_v5  }
  0x84   :  { %v122_v17 = vpop.permute.xlu1 %121 }
  0x91   :  { %v24_v6 = vpop.xlane.xlu0 %23 }
  0x92   :  { %v25_v7 = vmul.f32 0.00390625, %v24_v6 }
  0x94   :  { %27 = vst.msk [vmem:[#allocation2] sm:$0xf] %vm26_vm1, %v25_v7 }
  0x95   :  { %29 = vst.msk [vmem:[#allocation2 - $0x4] sm:$0xf0] %vm28_vm2, %v25_v7 }
  0x99   :  { %v38_v11 = vpop.permute.xlu0 %37 }
  0x9c   :  { %v34_v9 = vld [vmem:[#allocation2] sm:$0xf] }
  0x9d   :  { %238 = vmatpush3.msk.msra.mxu0 %vm44_vm3, %v34_v9 }
  0x9e   :  { %240 = vmatmul.mubr.msk.f32.vlgmr.msra.gmra.mrb[0].mxu0 %vm40_vm4, %v30_v8 }
 0x171   :  { %v114_v12 = vpop.f32.mrb[0].mxu0 }
 0x172   :  { %v115_v13 = vadd.f32 %v114_v12, %v38_v11  ;;  %v241_v14 = vpop.f32.mrb[1].mxu0 }
 0x174   :  { %v118_v15 = vmax.f32 %v115_v13, 0.0 }
 0x176   :  { %243 = vmatpush3.msk.msra.mxu1 %vm128_vm5, %v118_v15 }
 0x177   :  { %245 = vmatmul.mubr.msk.f32.vlgmr.msra.gmra.mrb[0].mxu1 %vm124_vm6, %v31_v16 }
 0x24a   :  { %v198_v18 = vpop.f32.mrb[0].mxu1 }
 0x24b   :  { %v199_v19 = vadd.f32 %v198_v18, %v122_v17  ;;  %v246_v20 = vpop.f32.mrb[1].mxu1 }
 0x24d   :  { %v232_v21 = vmul.f32 -1.442695, %v199_v19 }
 0x24f   :  { %253 = vpow2.f32 %v232_v21 }
 0x259   :  { %v254_v22 = vpop.eup %253 }
 0x25a   :  { %v205_v23 = vadd.f32 1.0, %v254_v22 }
 0x25c   :  { %255 = vrcp.f32 %v205_v23 }
 0x266   :  { %v256_v24 = vpop.eup %255 }
 0x267   :  { %208 = vst.msk [vmem:[#allocation3] sm:$0xf] %vm26_vm1, %v256_v24  ;;  %210 = vrot.lane.b32.xlu1 %v256_v24, %s260_s1 }
 0x2d9   :  { %v211_v25 = vpop.permute.xlu1 %210 }
 0x2da   :  { %213 = vst.msk [vmem:[#allocation3 + $0x4] sm:$0xf] %vm26_vm1, %v211_v25 }
 0x2e1   :  { %v214_v26 = vld [vmem:[#allocation3] sm:$0xff] }
 0x2e2   :  { %217 = vperm.xlu1 %252, %v214_v26  }
 0x361   :  { %v218_v27 = vpop.permute.xlu1 %217 }
 0x362   :  { %v220_v28 = vmul.f32 %v218_v27, %v20_v0  ;;  %v221_v29 = vmul.f32 %v218_v27, %v21_v1 }
 0x364   :  { %222 = vst [vmem:[%s323_s5] sm:$0xff] %v220_v28  ;;  %223 = vst [vmem:[%s323_s5 + $0x8] sm:$0xff] %v221_v29 }

</bundles_post_ra>
